<compile_context>
chip_gen: v5e
topology: v5e:2x2
jax: 0.10.0
libtpu: 0.0.40
codegen_flags: <defaults>
</compile_context>

<pallas_src>
import functools
import math

import jax
import jax.numpy as jnp
from jax import lax
from jax.experimental import pallas as pl
from jax.experimental.pallas import tpu as pltpu

# ----------------------------- configuration (small demo sizes) ----------------------
SENT_DIM = 64          # sent_dim
TR_NHEAD = 4           # tr_nhead
TR_FF = 128            # tr_ff_dim
TR_LAYERS = 2          # tr_num_layer
NUM_BLOCK = 3          # num_block
CN_NHEAD = 4           # cn_nhead
CN_OUT = SENT_DIM // CN_NHEAD   # out_channels (in_channels == heads * out_channels)
CN_FF = 128            # cn_ff_dim
CN_LAYERS = 2          # cn_num_layer
EDGE_DIM = 32          # edge_dim
NUM_CLASS = 7
HIDDEN_DIM = 768       # roberta-base hidden size (edge_attrs are 768-d too)
VOCAB = 50
TOK_LEN = 8
BIDIRECTIONAL = True


# ----------------------------- small in-kernel helpers -------------------------------
def _ln(x, g, b, eps=1e-5):
    mu = jnp.mean(x, axis=-1, keepdims=True)
    var = jnp.mean(jnp.square(x - mu), axis=-1, keepdims=True)
    return (x - mu) * lax.rsqrt(var + eps) * g + b


# ----------------------------- generic linear kernel ---------------------------------
def _linear_kernel(x_ref, w_ref, b_ref, o_ref, *, activation):
    y = jnp.dot(x_ref[...], w_ref[...], preferred_element_type=jnp.float32)
    y = y + b_ref[...]                      # (1, N) broadcasts over rows
    if activation == "relu":
        y = jnp.maximum(y, 0.0)
    o_ref[...] = y.astype(o_ref.dtype)


def pallas_linear(x, w, b=None, activation=None, compute_dtype=None,
                  block_m=512, pad_n_to=None):
    """X @ W + b.  compute_dtype=bf16 halves HBM traffic on the 768-wide paths.
    pad_n_to=128 keeps the output lane-dense (unmasked vst); sliced once outside."""
    M, K = x.shape
    N = w.shape[1]
    Np = N
    if pad_n_to is not None and N % pad_n_to != 0:
        Np = int(pl.cdiv(N, pad_n_to)) * pad_n_to
        w = jnp.pad(w, ((0, 0), (0, Np - N)))
        if b is not None:
            b = jnp.pad(b, (0, Np - N))
    cd = jnp.float32 if compute_dtype is None else compute_dtype
    x = x.astype(cd)
    w = w.astype(cd)
    if b is None:
        b = jnp.zeros((Np,), jnp.float32)
    b2 = b.reshape(1, Np).astype(jnp.float32)

    tm = M if M <= block_m else block_m
    grid_m = int(pl.cdiv(M, tm))
    Mp = grid_m * tm
    if Mp != M:
        # TODO(synk): at production M, prefer masked tail stores over this pad+slice pair.
        x = jnp.pad(x, ((0, Mp - M), (0, 0)))
    out = pl.pallas_call(
        functools.partial(_linear_kernel, activation=activation),
        out_shape=jax.ShapeDtypeStruct((Mp, Np), jnp.float32),
        grid=(grid_m,),
        in_specs=[
            pl.BlockSpec((tm, K), lambda i: (i, 0)),
            pl.BlockSpec((K, Np), lambda i: (0, 0)),
            pl.BlockSpec((1, Np), lambda i: (0, 0)),
        ],
        out_specs=pl.BlockSpec((tm, Np), lambda i: (i, 0)),
        compiler_params=pltpu.CompilerParams(dimension_semantics=("parallel",)),
    )(x, w, b2)
    if Mp != M:
        out = out[:M]
    if Np != N:
        out = out[:, :N]
    return out


# ----------------------------- fused transformer encoder layer -----------------------
def _tr_layer_kernel(x_ref, ucol_ref, urow_ref, scol_ref, srow_ref,
                     wqkv_ref, bqkv_ref, woh_ref, bo_ref,
                     ln1g_ref, ln1b_ref, w1_ref, b1_ref, w2_ref, b2_ref,
                     ln2g_ref, ln2b_ref, o_ref, attn_scr,
                     *, nhead, window, bidirectional):
    B, L = ucol_ref.shape[0], ucol_ref.shape[1]
    D = x_ref.shape[2]
    H = nhead
    dh = D // H
    scale = 1.0 / math.sqrt(dh)
    g = pl.program_id(0)

    x = x_ref[0].astype(jnp.float32)                         # (B*L, D), B folded into rows
    # one fused QKV projection: (B*L, D) @ (D, 3D), 192-lane MXU push
    qkv = jnp.dot(x, wqkv_ref[0], preferred_element_type=jnp.float32) + bqkv_ref[0]

    # branch mask rebuilt in-kernel from (B, L) vectors (no (3,B,L,L) HBM slab per layer)
    row = lax.broadcasted_iota(jnp.int32, (L, L), 0)
    col = lax.broadcasted_iota(jnp.int32, (L, L), 1)
    dist = row - col
    if bidirectional:
        win = jnp.abs(dist) <= window
    else:
        win = (dist >= 0) & (dist <= window)
    eye = row == col
    NEG = -1e9
    is_utt = (g == 0).astype(jnp.float32)
    is_sam = (g == 1).astype(jnp.float32)
    is_oth = (g == 2).astype(jnp.float32)

    woh = woh_ref[0]                                         # (H, dh, D) head-major out-proj

    for b in range(B):                                       # B static; matmuls below see all heads
        uc = ucol_ref[b] > 0                                 # (L, 1)
        ur = urow_ref[b] > 0                                 # (1, L)
        valid = uc & ur                                      # (L, L)
        same = scol_ref[b] == srow_ref[b]                    # (L, L)
        uttm = valid & win
        a_utt = jnp.where(uttm, 0.0, NEG)
        a_sam = jnp.where(uttm & same, 0.0, NEG)
        # keep diagonal so no valid row is fully masked (matches previous implementation)
        a_oth = jnp.where((uttm & jnp.logical_not(same)) | (eye & valid), 0.0, NEG)
        m_add = is_utt * a_utt + is_sam * a_sam + is_oth * a_oth

        qkv_b = qkv[b * L:(b + 1) * L, :]                    # (L, 3D)
        q_h = jnp.stack([qkv_b[:, h * dh:(h + 1) * dh] for h in range(H)], axis=0)
        k_h = jnp.stack([qkv_b[:, D + h * dh:D + (h + 1) * dh] for h in range(H)], axis=0)
        v_h = jnp.stack([qkv_b[:, 2 * D + h * dh:2 * D + (h + 1) * dh] for h in range(H)], axis=0)

        # head-batched attention (single einsum per stage, no per-head MXU pushes / concat)
        s = jnp.einsum('hqd,hkd->hqk', q_h, k_h,
                       preferred_element_type=jnp.float32) * scale + m_add[None]
        s = s - jnp.max(s, axis=-1, keepdims=True)
        p = jnp.exp(s)
        p = p * pl.reciprocal(jnp.sum(p, axis=-1, keepdims=True), approx=True)
        o_h = jnp.einsum('hqk,hkd->hqd', p, v_h, preferred_element_type=jnp.float32)
        # output projection folded per head: (H,L,dh) @ (H,dh,D) then sum over heads
        proj = jnp.einsum('hqd,hde->hqe', o_h, woh, preferred_element_type=jnp.float32)
        attn_scr[b * L:(b + 1) * L, :] = jnp.sum(proj, axis=0)

    attn = attn_scr[...] + bo_ref[0]
    h1 = _ln(x + attn, ln1g_ref[0], ln1b_ref[0])
    ff = jnp.maximum(jnp.dot(h1, w1_ref[0], preferred_element_type=jnp.float32)
                     + b1_ref[0], 0.0)
    y = jnp.dot(ff, w2_ref[0], preferred_element_type=jnp.float32) + b2_ref[0]
    o_ref[0] = _ln(h1 + y, ln2g_ref[0], ln2b_ref[0]).astype(o_ref.dtype)


def fused_transformer_layer(x, ucol, urow, scol, srow, lp, nhead, window):
    # x: (G, B*L, D) bf16 activations for the G mask-branches (batch folded into rows).
    G, BL, D = x.shape
    B, L = ucol.shape[0], ucol.shape[1]
    F = lp["w1"].shape[-1]
    H = nhead
    dh = D // H

    def wspec(shape):
        zeros = (0,) * len(shape)
        return pl.BlockSpec((1,) + shape, lambda g: (g,) + zeros)

    def fullspec(shape):
        zeros = (0,) * len(shape)
        return pl.BlockSpec(shape, lambda g: zeros)

    return pl.pallas_call(
        functools.partial(_tr_layer_kernel, nhead=nhead, window=window,
                          bidirectional=BIDIRECTIONAL),
        out_shape=jax.ShapeDtypeStruct((G, BL, D), x.dtype),
        grid=(G,),
        in_specs=[
            pl.BlockSpec((1, BL, D), lambda g: (g, 0, 0)),
            fullspec((B, L, 1)), fullspec((B, 1, L)),
            fullspec((B, L, 1)), fullspec((B, 1, L)),
            wspec((D, 3 * D)), wspec((1, 3 * D)),
            wspec((H, dh, D)), wspec((1, D)),
            wspec((1, D)), wspec((1, D)),
            wspec((D, F)), wspec((1, F)),
            wspec((F, D)), wspec((1, D)),
            wspec((1, D)), wspec((1, D)),
        ],
        out_specs=pl.BlockSpec((1, BL, D), lambda g: (g, 0, 0)),
        scratch_shapes=[pltpu.VMEM((BL, D), jnp.float32)],
        compiler_params=pltpu.CompilerParams(dimension_semantics=("parallel",)),
    )(x, ucol, urow, scol, srow, lp["wqkv"], lp["bqkv"], lp["wo_h"], lp["bo"],
      lp["ln1_g"], lp["ln1_b"], lp["w1"], lp["b1"], lp["w2"], lp["b2"],
      lp["ln2_g"], lp["ln2_b"])


# ----------------------------- fused fusion-attention over the block axis ------------
def _fusion_kernel(x_ref, fw_ref, fb_ref, fv_ref, o_ref, *, nblock, seq_l):
    L = seq_l
    x = x_ref[0].astype(jnp.float32)                         # (K*L, D) — one matmul, all blocks
    h = jnp.tanh(jnp.dot(x, fw_ref[...], preferred_element_type=jnp.float32) + fb_ref[...])
    sc = jnp.sum(h * fv_ref[...], axis=-1, keepdims=True)    # (K*L, 1)
    parts = [sc[k * L:(k + 1) * L, :] for k in range(nblock)]
    m = parts[0]
    for pk in parts[1:]:
        m = jnp.maximum(m, pk)
    es = [jnp.exp(pk - m) for pk in parts]
    den = es[0]
    for ek in es[1:]:
        den = den + ek
    inv = pl.reciprocal(den, approx=True)
    out = (es[0] * inv) * x[0:L, :]
    for k in range(1, nblock):
        out = out + (es[k] * inv) * x[k * L:(k + 1) * L, :]
    o_ref[0] = out.astype(o_ref.dtype)


def fused_fusion_attention(xf, p, nblock, seq_l):
    # xf: (B, K*L, D); additive attention over the block axis K, softmax fused.
    B, KL, D = xf.shape
    return pl.pallas_call(
        functools.partial(_fusion_kernel, nblock=nblock, seq_l=seq_l),
        out_shape=jax.ShapeDtypeStruct((B, seq_l, D), jnp.float32),
        grid=(B,),
        in_specs=[
            pl.BlockSpec((1, KL, D), lambda b: (b, 0, 0)),
            pl.BlockSpec((D, D), lambda b: (0, 0)),
            pl.BlockSpec((1, D), lambda b: (0, 0)),
            pl.BlockSpec((1, D), lambda b: (0, 0)),
        ],
        out_specs=pl.BlockSpec((1, seq_l, D), lambda b: (b, 0, 0)),
        compiler_params=pltpu.CompilerParams(dimension_semantics=("parallel",)),
    )(xf, p["fw"].astype(jnp.float32),
      p["fb"].reshape(1, D).astype(jnp.float32),
      p["fv"].reshape(1, D).astype(jnp.float32))


# ----------------------------- fused maxpool + projection (utterance encoder) --------
def _maxpool_linear_kernel(h_ref, w_ref, b_ref, o_ref):
    pooled = jnp.max(h_ref[...], axis=1)                     # (tu, 768) 'maxpooling', bf16
    y = jnp.dot(pooled, w_ref[...], preferred_element_type=jnp.float32) + b_ref[...]
    o_ref[...] = y.astype(o_ref.dtype)


def fused_maxpool_linear(hidden_bf16, w, b, block_u=256):
    # row-tiled ("parallel") so the (U, T, 768) bf16 slab is double-buffered per tile
    U, T, Hd = hidden_bf16.shape
    N = w.shape[1]
    tu = U if U <= block_u else block_u
    grid_u = int(pl.cdiv(U, tu))
    Up = grid_u * tu
    h = jnp.pad(hidden_bf16, ((0, Up - U), (0, 0), (0, 0))) if Up != U else hidden_bf16
    out = pl.pallas_call(
        _maxpool_linear_kernel,
        out_shape=jax.ShapeDtypeStruct((Up, N), jnp.float32),
        grid=(grid_u,),
        in_specs=[
            pl.BlockSpec((tu, T, Hd), lambda i: (i, 0, 0)),
            pl.BlockSpec((Hd, N), lambda i: (0, 0)),
            pl.BlockSpec((1, N), lambda i: (0, 0)),
        ],
        out_specs=pl.BlockSpec((tu, N), lambda i: (i, 0)),
        compiler_params=pltpu.CompilerParams(dimension_semantics=("parallel",)),
    )(h, w.astype(jnp.bfloat16), b.reshape(1, N).astype(jnp.float32))
    return out[:U] if Up != U else out


# ----------------------------- fused FFMLP (LN -> FFN -> residual -> LN) -------------
def _ffmlp_kernel(x_ref, n1g_ref, n1b_ref, w1_ref, b1_ref, w2_ref, b2_ref,
                  n2g_ref, n2b_ref, o_ref):
    x = x_ref[...].astype(jnp.float32)
    ss = _ln(x, n1g_ref[...], n1b_ref[...])
    h = jnp.maximum(jnp.dot(ss, w1_ref[...], preferred_element_type=jnp.float32)
                    + b1_ref[...], 0.0)
    y = jnp.dot(h, w2_ref[...], preferred_element_type=jnp.float32) + b2_ref[...]
    o_ref[...] = _ln(ss + y, n2g_ref[...], n2b_ref[...]).astype(o_ref.dtype)


def pallas_ffmlp(x, p, block_m=256):
    M, D = x.shape
    F = p["w1"].shape[1]
    tm = M if M <= block_m else block_m
    grid_m = int(pl.cdiv(M, tm))
    Mp = grid_m * tm
    xp = jnp.pad(x, ((0, Mp - M), (0, 0))) if Mp != M else x

    def full(s):
        zeros = (0,) * len(s)
        return pl.BlockSpec(s, lambda i: zeros)

    out = pl.pallas_call(
        _ffmlp_kernel,
        out_shape=jax.ShapeDtypeStruct((Mp, D), jnp.float32),
        grid=(grid_m,),
        in_specs=[pl.BlockSpec((tm, D), lambda i: (i, 0)),
                  full((1, D)), full((1, D)),
                  full((D, F)), full((1, F)), full((F, D)), full((1, D)),
                  full((1, D)), full((1, D))],
        out_specs=pl.BlockSpec((tm, D), lambda i: (i, 0)),
        compiler_params=pltpu.CompilerParams(dimension_semantics=("parallel",)),
    )(xp.astype(jnp.float32),
      p["n1_g"].reshape(1, D), p["n1_b"].reshape(1, D),
      p["w1"], p["b1"].reshape(1, F),
      p["w2"], p["b2"].reshape(1, D),
      p["n2_g"].reshape(1, D), p["n2_b"].reshape(1, D))
    return out[:M] if Mp != M else out


# ----------------------------- plain-JAX model glue ----------------------------------
def positional_encoding(L, D):
    pos = jnp.arange(L, dtype=jnp.float32)[:, None]
    i = jnp.arange(0, D, 2, dtype=jnp.float32)
    div = jnp.exp(-math.log(10000.0) * i / D)
    pe = jnp.zeros((L, D), jnp.float32)
    pe = pe.at[:, 0::2].set(jnp.sin(pos * div))
    pe = pe.at[:, 1::2].set(jnp.cos(pos * div))
    return pe


def batch_transformer_fwd(src, utt_mask, spk_mask, window, p):
    # matches BatchTransformer.forward for num_block == 3 (mode unused there)
    B, L, D = src.shape
    src = src + positional_encoding(L, D)[None]
    # inter-layer activation slab streams in bf16 (upcast to f32 inside the kernel)
    x = jnp.broadcast_to(src.reshape(1, B * L, D),
                         (NUM_BLOCK, B * L, D)).astype(jnp.bfloat16)
    ucol = utt_mask.reshape(B, L, 1).astype(jnp.int32)
    urow = utt_mask.reshape(B, 1, L).astype(jnp.int32)
    scol = spk_mask.reshape(B, L, 1).astype(jnp.int32)
    srow = spk_mask.reshape(B, 1, L).astype(jnp.int32)
    for lp in p["layers"]:                                    # one fused pallas_call per layer
        x = fused_transformer_layer(x, ucol, urow, scol, srow, lp, TR_NHEAD, window)
    # (G, B*L, D) -> (B, G*L, D) for the fusion kernel (JAX-side layout plumbing)
    xf = jnp.transpose(x.reshape(NUM_BLOCK, B, L, D), (1, 0, 2, 3)).reshape(B, NUM_BLOCK * L, D)
    return fused_fusion_attention(xf, p["fusion"], NUM_BLOCK, L)


def transformer_conv_fwd(x, edge_index, edge_attr, p):
    # PyG TransformerConv (concat=True, beta=True, root_weight=True, bias=False)
    N, D = x.shape
    H, C = CN_NHEAD, CN_OUT
    hc = H * C
    src, dst = edge_index[0], edge_index[1]
    # fused q|k|v|skip projection: x read once, lane-dense (N, 256) output
    qkvs = pallas_linear(x, p["wqkvs"], p["bqkvs"])
    q = qkvs[:, :hc].reshape(N, H, C)
    k = qkvs[:, hc:2 * hc].reshape(N, H, C)
    v = qkvs[:, 2 * hc:3 * hc].reshape(N, H, C)
    x_r = qkvs[:, 3 * hc:]                                   # lin_skip, bias=False
    e = pallas_linear(edge_attr, p["we"]).reshape(-1, H, C)  # lin_edge, bias=False
    k_j = k[src] + e
    v_j = v[src] + e
    q_i = q[dst]
    alpha = jnp.sum(q_i * k_j, axis=-1) / math.sqrt(C)       # (E, H)
    amax = jax.ops.segment_max(alpha, dst, num_segments=N)
    alpha = jnp.exp(alpha - amax[dst])
    denom = jax.ops.segment_sum(alpha, dst, num_segments=N)
    alpha = alpha / (denom[dst] + 1e-16)
    msg = v_j * alpha[..., None]
    out = jax.ops.segment_sum(msg, dst, num_segments=N).reshape(N, hc)
    # beta gate has output width 1 -> keep in plain JAX (a standalone N=1 Pallas matmul is
    # fully-masked stores + 1/256 MXU lane utilization)
    gate = jnp.dot(jnp.concatenate([out, x_r, out - x_r], axis=-1), p["wbeta"])
    beta = jax.nn.sigmoid(gate)
    return beta * x_r + (1.0 - beta) * out


def trmcn_fwd(x, edge_index, edge_attr, p):
    # edge_mapping Linear(768, edge_dim): bf16 operands, N padded to 128 for unmasked stores
    edge_attr = pallas_linear(edge_attr, p["map_w"], p["map_b"],
                              compute_dtype=jnp.bfloat16, pad_n_to=128)
    for i in range(CN_LAYERS):
        x = transformer_conv_fwd(x, edge_index, edge_attr, p["convs"][i])
        x = pallas_ffmlp(x, p["ffs"][i])
    return x


def utterance_encoder_fwd(conversations, masks, p):
    # all conversations batched into one fused, row-tiled (maxpool + projection) kernel
    # TODO(synk): the token mask is ignored, matching torch.max(hidden, dim=1)[0] on the stub.
    tokens = jnp.concatenate(conversations, axis=0)                  # (U_total, T)
    hidden = p["emb_table"][tokens].astype(jnp.bfloat16)             # encoder stub, bf16 traffic
    sent_all = fused_maxpool_linear(hidden, p["map_w"], p["map_b"])  # (U_total, sent_dim)
    sent_list, off = [], 0
    for tok in conversations:
        u = tok.shape[0]
        sent_list.append(sent_all[off:off + u])
        off += u
    return sent_list, sent_all


def batch_mental_model_fwd(params, conversations, masks, conv_len, utt_mask_list,
                           spk_mask_list, window, mode, edge_indices, edge_attrs):
    # choice == 'both'
    sent_list, graph_input = utterance_encoder_fwd(conversations, masks, params["uttrenc"])
    B = len(conv_len)
    Lmax = max(conv_len)
    utt_mask = jnp.stack([jnp.pad(u, (0, Lmax - u.shape[0])) for u in utt_mask_list])
    spk_mask = jnp.stack([jnp.pad(s, (0, Lmax - s.shape[0])) for s in spk_mask_list])
    conv_input = jnp.stack(
        [jnp.pad(e, ((0, Lmax - e.shape[0]), (0, 0))) for e in sent_list])
    ctx = batch_transformer_fwd(conv_input, utt_mask, spk_mask, window, params["convenc"])

    edge_attr = jnp.concatenate(edge_attrs, axis=0)
    # cumbatch offsets exactly as in the reference 'both' branch
    cum, count = [], 0
    for l in conv_len:
        cum += [count] * l
        count += l
    cumbatch = jnp.array([cum, cum], dtype=jnp.int32)
    edge_index = jnp.concatenate(edge_indices, axis=1) + cumbatch
    mental_emb = trmcn_fwd(graph_input, edge_index, edge_attr, params["tcn"])

    # torch.masked_select(ctx, utt_mask==1).view(-1, D)
    ctxt_emb = jnp.concatenate([ctx[b, : conv_len[b]] for b in range(B)], axis=0)
    concat_emb = jnp.concatenate([ctxt_emb, mental_emb], axis=1)   # (N_total, 2*sent_dim)
    # classifier N=7 -> padded to 128 lanes inside pallas_linear, sliced once here
    return pallas_linear(concat_emb, params["cls_w"], params["cls_b"], pad_n_to=128)


# ----------------------------- deterministic parameter init --------------------------
class KeyGen:
    def __init__(self, key):
        self.key = key

    def __call__(self):
        self.key, sub = jax.random.split(self.key)
        return sub


def _xavier(key, shape):
    fan_in, fan_out = shape[-2], shape[-1]
    a = math.sqrt(6.0 / (fan_in + fan_out))
    return jax.random.uniform(key, shape, jnp.float32, minval=-a, maxval=a)


def init_stacked_transformer_layer(kg, d, ff, nbranch, nhead):
    dh = d // nhead

    def one():
        wq, wk, wv = _xavier(kg(), (d, d)), _xavier(kg(), (d, d)), _xavier(kg(), (d, d))
        wo = _xavier(kg(), (d, d))
        return dict(
            wqkv=jnp.concatenate([wq, wk, wv], axis=1),    # fused (D, 3D)
            bqkv=jnp.zeros((1, 3 * d)),
            wo_h=wo.reshape(nhead, dh, d),                 # head-major out-proj (H, dh, D)
            bo=jnp.zeros((1, d)),
            ln1_g=jnp.ones((1, d)), ln1_b=jnp.zeros((1, d)),
            ln2_g=jnp.ones((1, d)), ln2_b=jnp.zeros((1, d)),
            w1=_xavier(kg(), (d, ff)), b1=jnp.zeros((1, ff)),
            w2=_xavier(kg(), (ff, d)), b2=jnp.zeros((1, d)),
        )
    branch = [one() for _ in range(nbranch)]
    return {k: jnp.stack([b_[k] for b_ in branch], axis=0) for k in branch[0]}


def init_conv_layer(kg, d, edge_dim):
    hc = CN_NHEAD * CN_OUT
    wq, wk, wv = _xavier(kg(), (d, hc)), _xavier(kg(), (d, hc)), _xavier(kg(), (d, hc))
    ws = _xavier(kg(), (d, hc))
    return dict(
        wqkvs=jnp.concatenate([wq, wk, wv, ws], axis=1),   # fused (D, 4*hc)
        bqkvs=jnp.zeros((4 * hc,)),                         # q/k/v biases (zero) | skip (no bias)
        we=_xavier(kg(), (edge_dim, hc)),
        wbeta=_xavier(kg(), (3 * hc, 1)),
    )


def init_ffmlp(kg, d, ff):
    return dict(
        n1_g=jnp.ones((d,)), n1_b=jnp.zeros((d,)),
        n2_g=jnp.ones((d,)), n2_b=jnp.zeros((d,)),
        w1=_xavier(kg(), (d, ff)), b1=jnp.zeros((ff,)),
        w2=_xavier(kg(), (ff, d)), b2=jnp.zeros((d,)),
    )


def init_params(key):
    kg = KeyGen(key)
    return dict(
        uttrenc=dict(
            emb_table=0.02 * jax.random.normal(kg(), (VOCAB, HIDDEN_DIM), jnp.float32),
            map_w=_xavier(kg(), (HIDDEN_DIM, SENT_DIM)), map_b=jnp.zeros((SENT_DIM,)),
        ),
        convenc=dict(
            layers=[init_stacked_transformer_layer(kg, SENT_DIM, TR_FF, NUM_BLOCK, TR_NHEAD)
                    for _ in range(TR_LAYERS)],
            fusion=dict(
                fw=_xavier(kg(), (SENT_DIM, SENT_DIM)), fb=jnp.zeros((SENT_DIM,)),
                fv=_xavier(kg(), (SENT_DIM, 1)).reshape(SENT_DIM),
            ),
        ),
        tcn=dict(
            map_w=_xavier(kg(), (HIDDEN_DIM, EDGE_DIM)), map_b=jnp.zeros((EDGE_DIM,)),
            convs=[init_conv_layer(kg, SENT_DIM, EDGE_DIM) for _ in range(CN_LAYERS)],
            ffs=[init_ffmlp(kg, SENT_DIM, CN_FF) for _ in range(CN_LAYERS)],
        ),
        cls_w=_xavier(kg(), (2 * SENT_DIM, NUM_CLASS)),
        cls_b=jnp.zeros((NUM_CLASS,)),
    )


# ----------------------------- demo --------------------------------------------------
if __name__ == "__main__":
    key = jax.random.PRNGKey(0)
    params = init_params(key)

    kg = KeyGen(jax.random.PRNGKey(1))
    conv_len = [5, 3]  # 2 conversations with 5 and 3 utterances
    conversations = [
        jax.random.randint(kg(), (5, TOK_LEN), 1, VOCAB, dtype=jnp.int32),
        jax.random.randint(kg(), (3, TOK_LEN), 1, VOCAB, dtype=jnp.int32),
    ]
    masks = [jnp.ones((5, TOK_LEN), jnp.int32), jnp.ones((3, TOK_LEN), jnp.int32)]
    utt_mask_list = [jnp.ones((5,), jnp.int32), jnp.ones((3,), jnp.int32)]
    spk_mask_list = [jnp.array([1, 2, 1, 2, 1], jnp.int32), jnp.array([1, 1, 2], jnp.int32)]
    # ring graphs: one outgoing edge per node so num_edges == conv_len (matches the
    # reference 'both'-branch cumbatch arithmetic)
    edge_indices = [
        jnp.array([[0, 1, 2, 3, 4], [1, 2, 3, 4, 0]], jnp.int32),
        jnp.array([[0, 1, 2], [1, 2, 0]], jnp.int32),
    ]
    edge_attrs = [
        jax.random.normal(kg(), (5, HIDDEN_DIM), jnp.float32),
        jax.random.normal(kg(), (3, HIDDEN_DIM), jnp.float32),
    ]

    logits = batch_mental_model_fwd(
        params, conversations, masks, conv_len, utt_mask_list, spk_mask_list,
        window=2, mode="so", edge_indices=edge_indices, edge_attrs=edge_attrs)
    logits = jax.block_until_ready(logits)

    assert logits.shape == (sum(conv_len), NUM_CLASS), logits.shape
    assert bool(jnp.all(jnp.isfinite(logits)))
    print("KERNEL_OK")
</pallas_src>

<mosaic_0001>
module attributes {stable_mosaic.version = 11 : i64} {
  func.func @_maxpool_linear_kernel(%arg0: i32, %arg1: memref<8x8x768xbf16, #tpu.memory_space<vmem>>, %arg2: memref<768x64xbf16, #tpu.memory_space<vmem>>, %arg3: memref<1x64xf32, #tpu.memory_space<vmem>>, %arg4: memref<8x64xf32, #tpu.memory_space<vmem>>) attributes {dimension_semantics = [#tpu.dimension_semantics<parallel>], iteration_bounds = array<i64: 1>, scalar_prefetch = 0 : i64, scratch_operands = 0 : i64, tpu.core_type = #tpu.core_type<tc>, window_params = [{transform_indices = @transform_0, window_bounds = array<i64: 8, 8, 768>}, {pipeline_mode = #tpu.pipeline_mode<synchronous>, transform_indices = @transform_1, window_bounds = array<i64: 768, 64>}, {pipeline_mode = #tpu.pipeline_mode<synchronous>, transform_indices = @transform_2, window_bounds = array<i64: 1, 64>}, {transform_indices = @transform_3, window_bounds = array<i64: 8, 64>}]} {
    %c0 = arith.constant 0 : index
    %c0_0 = arith.constant 0 : index
    %c0_1 = arith.constant 0 : index
    %0 = vector.load %arg1[%c0, %c0_0, %c0_1] : memref<8x8x768xbf16, #tpu.memory_space<vmem>>, vector<8x8x768xbf16>
    %cst = arith.constant dense<0xFF80> : vector<8x768xbf16>
    %1 = vector.multi_reduction <maximumf>, %0, %cst [1] : vector<8x8x768xbf16> to vector<8x768xbf16>
    %c0_2 = arith.constant 0 : index
    %c0_3 = arith.constant 0 : index
    %2 = vector.load %arg2[%c0_2, %c0_3] : memref<768x64xbf16, #tpu.memory_space<vmem>>, vector<768x64xbf16>
    %cst_4 = arith.constant dense<0.000000e+00> : vector<8x64xf32>
    %3 = tpu.matmul %1, %2, %cst_4 {dimension_numbers = #tpu.dot_dimension_numbers<[1], [0], [0], [1], [0, 0, 1, 1], [], []>} : vector<8x768xbf16>, vector<768x64xbf16>, vector<8x64xf32> -> vector<8x64xf32>
    %c0_5 = arith.constant 0 : index
    %c0_6 = arith.constant 0 : index
    %4 = vector.load %arg3[%c0_5, %c0_6] : memref<1x64xf32, #tpu.memory_space<vmem>>, vector<1x64xf32>
    %5 = vector.broadcast %4 : vector<1x64xf32> to vector<8x64xf32>
    %6 = arith.addf %3, %5 : vector<8x64xf32>
    %c0_7 = arith.constant 0 : index
    %c0_8 = arith.constant 0 : index
    %7 = vector.load %arg4[%c0_7, %c0_8] : memref<8x64xf32, #tpu.memory_space<vmem>>, vector<8x64xf32>
    tpu.vector_store %arg4[%c0_7, %c0_8], %6 {strides = array<i32>} : memref<8x64xf32, #tpu.memory_space<vmem>>, vector<8x64xf32>,
    return
  }
  func.func @transform_0(%arg0: i32) -> (i32, i32, i32) {
    %c0_i32 = arith.constant 0 : i32
    %c0_i32_0 = arith.constant 0 : i32
    %c0_i32_1 = arith.constant 0 : i32
    return %arg0, %c0_i32, %c0_i32_0 : i32, i32, i32
  }
  func.func @transform_1(%arg0: i32) -> (i32, i32) {
    %c0_i32 = arith.constant 0 : i32
    %c0_i32_0 = arith.constant 0 : i32
    %c0_i32_1 = arith.constant 0 : i32
    return %c0_i32, %c0_i32_0 : i32, i32
  }
  func.func @transform_2(%arg0: i32) -> (i32, i32) {
    %c0_i32 = arith.constant 0 : i32
    %c0_i32_0 = arith.constant 0 : i32
    %c0_i32_1 = arith.constant 0 : i32
    return %c0_i32, %c0_i32_0 : i32, i32
  }
  func.func @transform_3(%arg0: i32) -> (i32, i32) {
    %c0_i32 = arith.constant 0 : i32
    %c0_i32_0 = arith.constant 0 : i32
    return %arg0, %c0_i32 : i32, i32
  }
}

</mosaic_0001>

<bundles_post_ra>
// kernel: tpu_custom_call.1
= control target key start
LH: loop header
LB: loop body
LE: loop exit
PB: predicated region body
PF: predicated region fallthrough
CT: control target
= control target key end

     0   :  { %s1725_s0 = inlined_call_operand.vmem [shape: bf16[8,8,768], index: 0, kind: input, shape index: {}]   ;;  %s1726_s1 = inlined_call_operand.vmem [shape: bf16[768,64], index: 1, kind: input, shape index: {}]   ;;  %s1727_s2 = inlined_call_operand.vmem [shape: f32[1,64], index: 2, kind: input, shape index: {}]   ;;  %s1728_s3 = inlined_call_operand.hbm [shape: f32[8,64], index: 3, kind: output, shape index: {}]  }
   0x1   :  { %v1263_v0 = vld [vmem:[%s1726_s1 + $0x38] sm:$0xff]  ;;  %v1262_v2 = vld [vmem:[%s1726_s1 + $0x30] sm:$0xff]  ;;  %v1261_v8 = vld [vmem:[%s1726_s1 + $0x28] sm:$0xff] }
   0x2   :  { %v1271_v1 = vld [vmem:[%s1726_s1 + $0x78] sm:$0xff]  ;;  %968 = vmatpush.bf16.msra.mxu0 %v1263_v0  ;;  %v1270_v3 = vld [vmem:[%s1726_s1 + $0x70] sm:$0xff]  ;;  %v1269_v9 = vld [vmem:[%s1726_s1 + $0x68] sm:$0xff] }
   0x3   :  { %981 = vmatpush.bf16.msra.mxu1 %v1271_v1  ;;  %v1279_v4 = vld [vmem:[%s1726_s1 + $0xb8] sm:$0xff]  ;;  %v1278_v6 = vld [vmem:[%s1726_s1 + $0xb0] sm:$0xff]  ;;  %v1277_v10 = vld [vmem:[%s1726_s1 + $0xa8] sm:$0xff] }
   0x4   :  { %v1287_v5 = vld [vmem:[%s1726_s1 + $0xf8] sm:$0xff]  ;;  %994 = vmatpush.bf16.msra.mxu2 %v1279_v4  ;;  %v1286_v7 = vld [vmem:[%s1726_s1 + $0xf0] sm:$0xff]  ;;  %v1285_v11 = vld [vmem:[%s1726_s1 + $0xe8] sm:$0xff] }
   0x5   :  { %1007 = vmatpush.bf16.msra.mxu3 %v1287_v5  ;;  %v1260_v12 = vld [vmem:[%s1726_s1 + $0x20] sm:$0xff]  ;;  %v1409_v17 = vld [vmem:[%s1725_s0 + $0x18] sm:$0xff]  ;;  %v1414_v18 = vld [vmem:[%s1725_s0 + $0x30] sm:$0xff] }
   0x6   :  { %969 = vmatpush.bf16.msra.mxu0 %v1262_v2  ;;  %v1268_v13 = vld [vmem:[%s1726_s1 + $0x60] sm:$0xff]  ;;  %v1419_v19 = vld [vmem:[%s1725_s0 + $0x48] sm:$0xff]  ;;  %v45_v22 = vunpack.c.l.bf16 %v1409_v17  ;;  %v46_v24 = vunpack.c.h.bf16 %v1409_v17  ;;  %v1433_v25 = vld [vmem:[%s1725_s0 + $0x78] sm:$0xff]  ;;  %v51_v28 = vunpack.c.l.bf16 %v1414_v18  ;;  %v52_v31 = vunpack.c.h.bf16 %v1414_v18 }
   0x7   :  { %982 = vmatpush.bf16.msra.mxu1 %v1270_v3  ;;  %v1276_v14 = vld [vmem:[%s1726_s1 + $0xa0] sm:$0xff]  ;;  %v1438_v26 = vld [vmem:[%s1725_s0 + $0x90] sm:$0xff]  ;;  %v1443_v27 = vld [vmem:[%s1725_s0 + $0xa8] sm:$0xff]  ;;  %v57_v29 = vunpack.c.l.bf16 %v1419_v19  ;;  %v69_v34 = vunpack.c.l.bf16 %v1433_v25 }
   0x8   :  { %995 = vmatpush.bf16.msra.mxu2 %v1278_v6  ;;  %v1284_v15 = vld [vmem:[%s1726_s1 + $0xe0] sm:$0xff]  ;;  %v1259_v32 = vld [vmem:[%s1726_s1 + $0x18] sm:$0xff]  ;;  %v75_v35 = vunpack.c.l.bf16 %v1438_v26  ;;  %v81_v36 = vunpack.c.l.bf16 %v1443_v27  ;;  %v123_v38 = vrot.slane %v45_v22, 4  ;;  %v159_v39 = vrot.slane %v51_v28, 4 }
   0x9   :  { %1008 = vmatpush.bf16.msra.mxu3 %v1286_v7  ;;  %v1404_v16 = vld [vmem:[%s1725_s0] sm:$0xff]  ;;  %v1267_v33 = vld [vmem:[%s1726_s1 + $0x58] sm:$0xff]  ;;  %v195_v40 = vrot.slane %v57_v29, 4  ;;  %v267_v45 = vrot.slane %v69_v34, 4 }
   0xa   :  { %970 = vmatpush.bf16.msra.mxu0 %v1261_v8  ;;  %v1424_v20 = vld [vmem:[%s1725_s0 + $0x60] sm:$0xff]  ;;  %v39_v21 = vunpack.c.l.bf16 %v1404_v16  ;;  %v40_v23 = vunpack.c.h.bf16 %v1404_v16  ;;  %v1275_v42 = vld [vmem:[%s1726_s1 + $0x98] sm:$0xff]  ;;  %v303_v46 = vrot.slane %v75_v35, 4  ;;  %v339_v47 = vrot.slane %v81_v36, 4 }
   0xb   :  { %983 = vmatpush.bf16.msra.mxu1 %v1269_v9  ;;  %v63_v30 = vunpack.c.l.bf16 %v1424_v20  ;;  %v1283_v43 = vld [vmem:[%s1726_s1 + $0xd8] sm:$0xff]  ;;  %v124_v48 = vmax.f32 %v45_v22, %v123_v38  ;;  %v160_v49 = vmax.f32 %v51_v28, %v159_v39  ;;  %v196_v50 = vmax.f32 %v57_v29, %v195_v40 }
   0xc   :  { %996 = vmatpush.bf16.msra.mxu2 %v1277_v10  ;;  %v87_v37 = vrot.slane %v39_v21, 4 }
   0xd   :  { %1009 = vmatpush.bf16.msra.mxu3 %v1285_v11  ;;  %v231_v41 = vrot.slane %v63_v30, 4 }
   0xe   :  { %971 = vmatpush.bf16.msra.mxu0 %v1260_v12  ;;  %v88_v44 = vmax.f32 %v39_v21, %v87_v37 }
   0xf   :  { %984 = vmatpush.bf16.msra.mxu1 %v1268_v13  ;;  %v232_v51 = vmax.f32 %v63_v30, %v231_v41 }
  0x10   :  { %997 = vmatpush.bf16.msra.mxu2 %v1276_v14 }
  0x11   :  { %1010 = vmatpush.bf16.msra.mxu3 %v1284_v15 }
  0x12   :  { %8 = vsyncpa [#allocation3], 0  ;;  %972 = vmatpush.bf16.msra.mxu0 %v1259_v32  ;;  %v1258_v52 = vld [vmem:[%s1726_s1 + $0x10] sm:$0xff]  ;;  %v89_v54 = vrot.slane %v88_v44, 2  ;;  %v268_v55 = vmax.f32 %v69_v34, %v267_v45  ;;  %v304_v56 = vmax.f32 %v75_v35, %v303_v46  ;;  %v340_v57 = vmax.f32 %v81_v36, %v339_v47  ;;  %v1257_v8 = vld [vmem:[%s1726_s1 + $0x8] sm:$0xff]  ;;  %s1332_s21 = smov [#allocation2]  }
  0x13   :  { %985 = vmatpush.bf16.msra.mxu1 %v1267_v33  ;;  %v1266_v53 = vld [vmem:[%s1726_s1 + $0x50] sm:$0xff]  ;;  %v125_v58 = vrot.slane %v124_v48, 2  ;;  %v161_v59 = vrot.slane %v160_v49, 2  ;;  %v197_v60 = vrot.slane %v196_v50, 2  ;;  %v233_v61 = vrot.slane %v232_v51, 2  ;;  %v1265_v9 = vld [vmem:[%s1726_s1 + $0x48] sm:$0xff] }
  0x14   :  { %998 = vmatpush.bf16.msra.mxu2 %v1275_v42  ;;  %v1274_v62 = vld [vmem:[%s1726_s1 + $0x90] sm:$0xff]  ;;  %v90_v0 = vmax.f32 %v88_v44, %v89_v54  ;;  %v269_v1 = vrot.slane %v268_v55, 2  ;;  %v305_v2 = vrot.slane %v304_v56, 2  ;;  %v341_v3 = vrot.slane %v340_v57, 2  ;;  %v1273_v28 = vld [vmem:[%s1726_s1 + $0x88] sm:$0xff]  ;;  %v1256_v39 = vld [vmem:[%s1726_s1] sm:$0xff] }
  0x15   :  { %1011 = vmatpush.bf16.msra.mxu3 %v1283_v43  ;;  %v1282_v63 = vld [vmem:[%s1726_s1 + $0xd0] sm:$0xff]  ;;  %vm619_vm0 = vcmask 1041409   ;;  %v126_v4 = vmax.f32 %v124_v48, %v125_v58  ;;  %v162_v5 = vmax.f32 %v160_v49, %v161_v59  ;;  %v198_v6 = vmax.f32 %v196_v50, %v197_v60  ;;  %v1281_v29 = vld [vmem:[%s1726_s1 + $0xc8] sm:$0xff]  ;;  %v1264_v40 = vld [vmem:[%s1726_s1 + $0x40] sm:$0xff]  ;;  %s1053_s22 = sshll.u32 %s1332_s21, 4  ;;  %s1055_s25 = sshll.u32 %s1728_s3, 4  ;;  %s1054_s22 = int_to_ptr.vmem [resolvable:$true] %s1053_s22  ;;  %s1056_s25 = int_to_ptr.hbm [resolvable:$true] %s1055_s25 }
  0x16   :  { %v234_v7 = vmax.f32 %v232_v51, %v233_v61  ;;  %vm621_vm1 = vcmask 1042434   ;;  %973 = vmatpush.bf16.msra.mxu0 %v1258_v52  ;;  %v91_v10 = vrot.slane %v90_v0, 1  ;;  %v270_v11 = vmax.f32 %v268_v55, %v269_v1  ;;  %v1295_v45 = vld [vmem:[%s1726_s1 + $0x138] sm:$0xff]  ;;  %v1280_v55 = vld [vmem:[%s1726_s1 + $0xc0] sm:$0xff]  ;;  %v1301_v16 = vld [vmem:[%s1726_s1 + $0x168] sm:$0xff] }
  0x17   :  { %986 = vmatpush.bf16.msra.mxu1 %v1266_v53  ;;  %v306_v12 = vmax.f32 %v304_v56, %v305_v2  ;;  %v342_v13 = vmax.f32 %v340_v57, %v341_v3  ;;  %vm623_vm2 = vcmask 1043459   ;;  %v127_v14 = vrot.slane %v126_v4, 1  ;;  %v1303_v46 = vld [vmem:[%s1726_s1 + $0x178] sm:$0xff] }
  0x18   :  { %v163_v15 = vrot.slane %v162_v5, 1  ;;  %v199_v21 = vrot.slane %v198_v6, 1  ;;  %v235_v22 = vrot.slane %v234_v7, 1  ;;  %vm625_vm3 = vcmask 1044484   ;;  %999 = vmatpush.bf16.msra.mxu2 %v1274_v62 }
  0x19   :  { %1012 = vmatpush.bf16.msra.mxu3 %v1282_v63  ;;  %v92_v30 = vmax.f32 %v90_v0, %v91_v10  ;;  %v271_v32 = vrot.slane %v270_v11, 1  ;;  %v307_v33 = vrot.slane %v306_v12, 1  ;;  %v343_v34 = vrot.slane %v342_v13, 1  ;;  %v1302_v0 = vld [vmem:[%s1726_s1 + $0x170] sm:$0xff] }
  0x1a   :  { %vm627_vm4 = vcmask 1045509   ;;  %v128_v35 = vmax.f32 %v126_v4, %v127_v14  ;;  %v164_v36 = vmax.f32 %v162_v5, %v163_v15  ;;  %v200_v37 = vmax.f32 %v198_v6, %v199_v21  ;;  %974 = vmatpush.bf16.msra.mxu0 %v1257_v8 }
  0x1b   :  { %v236_v38 = vmax.f32 %v234_v7, %v235_v22  ;;  %vm629_vm5 = vcmask 1046534   ;;  %987 = vmatpush.bf16.msra.mxu1 %v1265_v9  ;;  %v272_v41 = vmax.f32 %v270_v11, %v271_v32  ;;  %v308_v42 = vmax.f32 %v306_v12, %v307_v33 }
  0x1c   :  { %v344_v43 = vmax.f32 %v342_v13, %v343_v34  ;;  %vm631_vm6 = vcmask 1047559   ;;  %v58_v44 = vunpack.c.h.bf16 %v1419_v19  ;;  %v375_v47 = vpack.c.bf16 %v92_v30, %v92_v30  ;;  %1000 = vmatpush.bf16.msra.mxu2 %v1273_v28  ;;  %v1272_v19 = vld [vmem:[%s1726_s1 + $0x80] sm:$0xff]  ;;  %v1293_v28 = vld [vmem:[%s1726_s1 + $0x128] sm:$0xff] }
  0x1d   :  { %v381_v48 = vpack.c.bf16 %v128_v35, %v128_v35  ;;  %v387_v49 = vpack.c.bf16 %v164_v36, %v164_v36  ;;  %v393_v50 = vpack.c.bf16 %v200_v37, %v200_v37  ;;  %1013 = vmatpush.bf16.msra.mxu3 %v1281_v29  ;;  %v399_v51 = vpack.c.bf16 %v236_v38, %v236_v38 }
  0x1e   :  { %v405_v52 = vpack.c.bf16 %v272_v41, %v272_v41  ;;  %v411_v53 = vpack.c.bf16 %v308_v42, %v308_v42  ;;  %v64_v54 = vunpack.c.h.bf16 %v1424_v20  ;;  %v417_v56 = vpack.c.bf16 %v344_v43, %v344_v43  ;;  %975 = vmatpush.bf16.msra.mxu0 %v1256_v39  ;;  %v1294_v20 = vld [vmem:[%s1726_s1 + $0x130] sm:$0xff] }
  0x1f   :  { %v571_v57 = vunpack.c.l.b16 %v375_v47  ;;  %v577_v58 = vunpack.c.l.b16 %v381_v48  ;;  %v583_v59 = vunpack.c.l.b16 %v387_v49  ;;  %988 = vmatpush.bf16.msra.mxu1 %v1264_v40  ;;  %v589_v60 = vunpack.c.l.b16 %v393_v50 }
  0x20   :  { %v595_v61 = vunpack.c.l.b16 %v399_v51  ;;  %v601_v62 = vunpack.c.l.b16 %v405_v52  ;;  %v607_v63 = vunpack.c.l.b16 %v411_v53  ;;  %v613_v1 = vunpack.c.l.b16 %v417_v56  ;;  %1001 = vmatpush.bf16.msra.mxu2 %v1272_v19 }
  0x21   :  { %v620_v2 = vsel %vm619_vm0, %v577_v58, %v571_v57  ;;  %v70_v3 = vunpack.c.h.bf16 %v1433_v25  ;;  %v76_v4 = vunpack.c.h.bf16 %v1438_v26  ;;  %v82_v6 = vunpack.c.h.bf16 %v1443_v27  ;;  %1014 = vmatpush.bf16.msra.mxu3 %v1280_v55 }
  0x22   :  { %1020 = vmatpush.bf16.msrb.mxu0 %v1295_v45  ;;  %v622_v5 = vsel %vm621_vm1, %v583_v59, %v620_v2  ;;  %v93_v7 = vrot.slane %v40_v23, 4  ;;  %v129_v8 = vrot.slane %v46_v24, 4  ;;  %v165_v10 = vrot.slane %v52_v31, 4 }
  0x23   :  { %1033 = vmatpush.bf16.msrb.mxu1 %v1303_v46  ;;  %v624_v9 = vsel %vm623_vm2, %v589_v60, %v622_v5  ;;  %v201_v25 = vrot.slane %v58_v44, 4  ;;  %v237_v11 = vrot.slane %v64_v54, 4  ;;  %v273_v13 = vrot.slane %v70_v3, 4 }
  0x24   :  { %v626_v26 = vsel %vm625_vm3, %v595_v61, %v624_v9  ;;  %v94_v27 = vmax.f32 %v40_v23, %v93_v7  ;;  %v130_v12 = vmax.f32 %v46_v24, %v129_v8  ;;  %v166_v15 = vmax.f32 %v52_v31, %v165_v10 }
  0x25   :  { %v628_v14 = vsel %vm627_vm4, %v601_v62, %v626_v26  ;;  %v202_v21 = vmax.f32 %v58_v44, %v201_v25  ;;  %v309_v22 = vrot.slane %v76_v4, 4  ;;  %v238_v29 = vmax.f32 %v64_v54, %v237_v11  ;;  %v1561_v25 = vld [vmem:[%s1725_s0 + $0x38] sm:$0xff]  ;;  %v1566_v11 = vld [vmem:[%s1725_s0 + $0x50] sm:$0xff] }
  0x26   :  { %1021 = vmatpush.bf16.msrb.mxu0 %v1294_v20  ;;  %v630_v17 = vsel %vm629_vm5, %v607_v63, %v628_v14  ;;  %v95_v23 = vrot.slane %v94_v27, 2  ;;  %v131_v24 = vrot.slane %v130_v12, 2  ;;  %v167_v32 = vrot.slane %v166_v15, 2  ;;  %v1545_v20 = vld [vmem:[%s1725_s0 + $0x8] sm:$0xff]  ;;  %v1577_v14 = vld [vmem:[%s1725_s0 + $0x80] sm:$0xff] }
  0x27   :  { %1034 = vmatpush.bf16.msrb.mxu1 %v1302_v0  ;;  %v632_v30 = vsel %vm631_vm6, %v613_v1, %v630_v17  ;;  %v203_v18 = vrot.slane %v202_v21, 2  ;;  %v274_v31 = vmax.f32 %v70_v3, %v273_v13  ;;  %v239_v36 = vrot.slane %v238_v29, 2  ;;  %v1292_v0 = vld [vmem:[%s1726_s1 + $0x120] sm:$0xff]  ;;  %v1572_v13 = vld [vmem:[%s1725_s0 + $0x68] sm:$0xff]  ;;  %v1589_v17 = vld [vmem:[%s1725_s0 + $0xb0] sm:$0xff] }
  0x28   :  { %v668_v33 = vpack.c.b16 %v632_v30, %v632_v30  ;;  %v96_v34 = vmax.f32 %v94_v27, %v95_v23  ;;  %v132_v35 = vmax.f32 %v130_v12, %v131_v24  ;;  %v168_v37 = vmax.f32 %v166_v15, %v167_v32  ;;  %v1300_v1 = vld [vmem:[%s1726_s1 + $0x160] sm:$0xff] }
  0x29   :  { %v204_v38 = vmax.f32 %v202_v21, %v203_v18  ;;  %v275_v39 = vrot.slane %v274_v31, 2  ;;  %v310_v40 = vmax.f32 %v76_v4, %v309_v22  ;;  %v240_v43 = vmax.f32 %v238_v29, %v239_v36 }
  0x2a   :  { %1022 = vmatpush.bf16.msrb.mxu0 %v1293_v28  ;;  %v97_v41 = vrot.slane %v96_v34, 1  ;;  %v133_v42 = vrot.slane %v132_v35, 1  ;;  %v345_v44 = vrot.slane %v82_v6, 4  ;;  %v169_v45 = vrot.slane %v168_v37, 1 }
  0x2b   :  { %1035 = vmatpush.bf16.msrb.mxu1 %v1301_v16  ;;  %976 = vmatmul.bf16.vlgmr.msra.gmra.mxu0 %v668_v33  ;;  %v205_v46 = vrot.slane %v204_v38, 1  ;;  %v276_v47 = vmax.f32 %v274_v31, %v275_v39  ;;  %v311_v48 = vrot.slane %v310_v40, 2  ;;  %v241_v51 = vrot.slane %v240_v43, 1  ;;  %v1584_v16 = vld [vmem:[%s1725_s0 + $0x98] sm:$0xff] }
  0x2c   :  { %v98_v49 = vmax.f32 %v96_v34, %v97_v41  ;;  %v134_v50 = vmax.f32 %v132_v35, %v133_v42  ;;  %v346_v52 = vmax.f32 %v82_v6, %v345_v44  ;;  %v170_v53 = vmax.f32 %v168_v37, %v169_v45  ;;  %v1556_v6 = vld [vmem:[%s1725_s0 + $0x20] sm:$0xff] }
  0x2d   :  { %v206_v54 = vmax.f32 %v204_v38, %v205_v46  ;;  %v277_v19 = vrot.slane %v276_v47, 1  ;;  %v312_v55 = vmax.f32 %v310_v40, %v311_v48  ;;  %v242_v56 = vmax.f32 %v240_v43, %v241_v51 }
  0x2e   :  { %v347_v57 = vrot.slane %v346_v52, 2  ;;  %v376_v58 = vpack.c.bf16 %v98_v49, %v98_v49  ;;  %v382_v59 = vpack.c.bf16 %v134_v50, %v134_v50  ;;  %v388_v62 = vpack.c.bf16 %v170_v53, %v170_v53  ;;  %1023 = vmatpush.bf16.msrb.mxu0 %v1292_v0 }
  0x2f   :  { %v278_v60 = vmax.f32 %v276_v47, %v277_v19  ;;  %v313_v61 = vrot.slane %v312_v55, 1  ;;  %v394_v63 = vpack.c.bf16 %v206_v54, %v206_v54  ;;  %v400_v3 = vpack.c.bf16 %v242_v56, %v242_v56  ;;  %1036 = vmatpush.bf16.msrb.mxu1 %v1300_v1 }
  0x30   :  { %v348_v2 = vmax.f32 %v346_v52, %v347_v57  ;;  %v572_v4 = vunpack.c.l.b16 %v376_v58  ;;  %v578_v5 = vunpack.c.l.b16 %v382_v59  ;;  %v584_v9 = vunpack.c.l.b16 %v388_v62 }
  0x31   :  { %v314_v7 = vmax.f32 %v312_v55, %v313_v61  ;;  %v406_v8 = vpack.c.bf16 %v278_v60, %v278_v60  ;;  %v590_v10 = vunpack.c.l.b16 %v394_v63  ;;  %v596_v27 = vunpack.c.l.b16 %v400_v3 }
  0x32   :  { %v349_v26 = vrot.slane %v348_v2, 1  ;;  %v633_v12 = vsel %vm619_vm0, %v578_v5, %v572_v4  ;;  %v41_v15 = vunpack.c.l.bf16 %v1545_v20  ;;  %v47_v23 = vunpack.c.l.bf16 %v1556_v6 }
  0x33   :  { %v412_v21 = vpack.c.bf16 %v314_v7, %v314_v7  ;;  %v602_v22 = vunpack.c.l.b16 %v406_v8  ;;  %v634_v28 = vsel %vm621_vm1, %v584_v9, %v633_v12  ;;  %v53_v30 = vunpack.c.l.bf16 %v1561_v25 }
  0x34   :  { %v350_v24 = vmax.f32 %v348_v2, %v349_v26  ;;  %v635_v29 = vsel %vm623_vm2, %v590_v10, %v634_v28  ;;  %v59_v32 = vunpack.c.l.bf16 %v1566_v11  ;;  %v65_v33 = vunpack.c.l.bf16 %v1572_v13 }
  0x35   :  { %v608_v18 = vunpack.c.l.b16 %v412_v21  ;;  %v636_v31 = vsel %vm625_vm3, %v596_v27, %v635_v29  ;;  %v71_v34 = vunpack.c.l.bf16 %v1577_v14  ;;  %v77_v37 = vunpack.c.l.bf16 %v1584_v16 }
  0x36   :  { %v418_v35 = vpack.c.bf16 %v350_v24, %v350_v24  ;;  %v637_v36 = vsel %vm627_vm4, %v602_v22, %v636_v31  ;;  %v83_v38 = vunpack.c.l.bf16 %v1589_v17  ;;  %v99_v40 = vrot.slane %v41_v15, 4 }
  0x37   :  { %v638_v39 = vsel %vm629_vm5, %v608_v18, %v637_v36  ;;  %v135_v41 = vrot.slane %v47_v23, 4  ;;  %v171_v42 = vrot.slane %v53_v30, 4  ;;  %v207_v44 = vrot.slane %v59_v32, 4 }
  0x38   :  { %v614_v43 = vunpack.c.l.b16 %v418_v35  ;;  %v243_v45 = vrot.slane %v65_v33, 4  ;;  %v279_v46 = vrot.slane %v71_v34, 4  ;;  %v100_v47 = vmax.f32 %v41_v15, %v99_v40  ;;  %v1299_v40 = vld [vmem:[%s1726_s1 + $0x158] sm:$0xff] }
  0x39   :  { %v136_v48 = vmax.f32 %v47_v23, %v135_v41  ;;  %v172_v49 = vmax.f32 %v53_v30, %v171_v42  ;;  %v315_v50 = vrot.slane %v77_v37, 4  ;;  %v208_v52 = vmax.f32 %v59_v32, %v207_v44  ;;  %1037 = vmatpush.bf16.msrb.mxu1 %v1299_v40 }
  0x3a   :  { %v639_v51 = vsel %vm631_vm6, %v614_v43, %v638_v39  ;;  %v244_v53 = vmax.f32 %v65_v33, %v243_v45  ;;  %v280_v54 = vmax.f32 %v71_v34, %v279_v46  ;;  %v101_v55 = vrot.slane %v100_v47, 2  ;;  %v1291_v39 = vld [vmem:[%s1726_s1 + $0x118] sm:$0xff] }
  0x3b   :  { %v669_v19 = vpack.c.b16 %v639_v51, %v639_v51  ;;  %v137_v56 = vrot.slane %v136_v48, 2  ;;  %v173_v57 = vrot.slane %v172_v49, 2  ;;  %v209_v58 = vrot.slane %v208_v52, 2  ;;  %1024 = vmatpush.bf16.msrb.mxu0 %v1291_v39 }
  0x3c   :  { %v245_v59 = vrot.slane %v244_v53, 2  ;;  %v281_v60 = vrot.slane %v280_v54, 2  ;;  %v316_v61 = vmax.f32 %v77_v37, %v315_v50  ;;  %v102_v62 = vmax.f32 %v100_v47, %v101_v55  ;;  %v1298_v50 = vld [vmem:[%s1726_s1 + $0x150] sm:$0xff] }
  0x3d   :  { %989 = vmatmul.bf16.vlgmr.msra.gmra.mxu1 %v669_v19  ;;  %v138_v63 = vmax.f32 %v136_v48, %v137_v56  ;;  %v174_v0 = vmax.f32 %v172_v49, %v173_v57  ;;  %v351_v1 = vrot.slane %v83_v38, 4  ;;  %v210_v2 = vmax.f32 %v208_v52, %v209_v58  ;;  %v1290_v49 = vld [vmem:[%s1726_s1 + $0x110] sm:$0xff] }
  0x3e   :  { %v246_v3 = vmax.f32 %v244_v53, %v245_v59  ;;  %v282_v4 = vmax.f32 %v280_v54, %v281_v60  ;;  %v317_v5 = vrot.slane %v316_v61, 2  ;;  %v103_v7 = vrot.slane %v102_v62, 1  ;;  %1038 = vmatpush.bf16.msrb.mxu1 %v1298_v50 }
  0x3f   :  { %v139_v8 = vrot.slane %v138_v63, 1  ;;  %v175_v9 = vrot.slane %v174_v0, 1  ;;  %v352_v10 = vmax.f32 %v83_v38, %v351_v1  ;;  %v211_v26 = vrot.slane %v210_v2, 1  ;;  %1025 = vmatpush.bf16.msrb.mxu0 %v1290_v49 }
  0x40   :  { %v247_v27 = vrot.slane %v246_v3, 1  ;;  %v283_v12 = vrot.slane %v282_v4, 1  ;;  %v318_v15 = vmax.f32 %v316_v61, %v317_v5  ;;  %v104_v21 = vmax.f32 %v102_v62, %v103_v7 }
  0x41   :  { %v140_v22 = vmax.f32 %v138_v63, %v139_v8  ;;  %v176_v28 = vmax.f32 %v174_v0, %v175_v9  ;;  %v353_v23 = vrot.slane %v352_v10, 2  ;;  %v212_v24 = vmax.f32 %v210_v2, %v211_v26 }
  0x42   :  { %v248_v29 = vmax.f32 %v246_v3, %v247_v27  ;;  %v284_v30 = vmax.f32 %v282_v4, %v283_v12  ;;  %v319_v32 = vrot.slane %v318_v15, 1  ;;  %v377_v31 = vpack.c.bf16 %v104_v21, %v104_v21  ;;  %v1288_v12 = vld [vmem:[%s1726_s1 + $0x100] sm:$0xff] }
  0x43   :  { %v354_v18 = vmax.f32 %v352_v10, %v353_v23  ;;  %v383_v33 = vpack.c.bf16 %v140_v22, %v140_v22  ;;  %v389_v34 = vpack.c.bf16 %v176_v28, %v176_v28  ;;  %v395_v36 = vpack.c.bf16 %v212_v24, %v212_v24 }
  0x44   :  { %v320_v35 = vmax.f32 %v318_v15, %v319_v32  ;;  %v401_v37 = vpack.c.bf16 %v248_v29, %v248_v29  ;;  %v407_v38 = vpack.c.bf16 %v284_v30, %v284_v30  ;;  %v573_v42 = vunpack.c.l.b16 %v377_v31  ;;  %v1296_v15 = vld [vmem:[%s1726_s1 + $0x140] sm:$0xff] }
  0x45   :  { %v355_v41 = vrot.slane %v354_v18, 1  ;;  %v579_v43 = vunpack.c.l.b16 %v383_v33  ;;  %v585_v44 = vunpack.c.l.b16 %v389_v34  ;;  %v591_v46 = vunpack.c.l.b16 %v395_v36 }
  0x46   :  { %v413_v45 = vpack.c.bf16 %v320_v35, %v320_v35  ;;  %v597_v47 = vunpack.c.l.b16 %v401_v37  ;;  %v603_v48 = vunpack.c.l.b16 %v407_v38  ;;  %v42_v53 = vunpack.c.h.bf16 %v1545_v20 }
  0x47   :  { %v356_v51 = vmax.f32 %v354_v18, %v355_v41  ;;  %v640_v52 = vsel %vm619_vm0, %v579_v43, %v573_v42  ;;  %v48_v54 = vunpack.c.h.bf16 %v1556_v6  ;;  %v54_v56 = vunpack.c.h.bf16 %v1561_v25  ;;  %v1289_v25 = vld [vmem:[%s1726_s1 + $0x108] sm:$0xff] }
  0x48   :  { %v609_v19 = vunpack.c.l.b16 %v413_v45  ;;  %v641_v55 = vsel %vm621_vm1, %v585_v44, %v640_v52  ;;  %v60_v57 = vunpack.c.h.bf16 %v1566_v11  ;;  %v66_v60 = vunpack.c.h.bf16 %v1572_v13  ;;  %v1297_v11 = vld [vmem:[%s1726_s1 + $0x148] sm:$0xff]  ;;  %1026 = vmatpush.bf16.msrb.mxu0 %v1289_v25 }
  0x49   :  { %v419_v58 = vpack.c.bf16 %v356_v51, %v356_v51  ;;  %v642_v59 = vsel %vm623_vm2, %v591_v46, %v641_v55  ;;  %v72_v61 = vunpack.c.h.bf16 %v1577_v14  ;;  %v78_v20 = vunpack.c.h.bf16 %v1584_v16  ;;  %1039 = vmatpush.bf16.msrb.mxu1 %v1297_v11 }
  0x4a   :  { %v643_v62 = vsel %vm625_vm3, %v597_v47, %v642_v59  ;;  %v84_v6 = vunpack.c.h.bf16 %v1589_v17  ;;  %v105_v63 = vrot.slane %v42_v53, 4  ;;  %v141_v0 = vrot.slane %v48_v54, 4 }
  0x4b   :  { %v615_v13 = vunpack.c.l.b16 %v419_v58  ;;  %v644_v14 = vsel %vm627_vm4, %v603_v48, %v643_v62  ;;  %v177_v1 = vrot.slane %v54_v56, 4  ;;  %v213_v17 = vrot.slane %v60_v57, 4  ;;  %v1645_v58 = vld [vmem:[%s1725_s0 + $0x10] sm:$0xff] }
  0x4c   :  { %v645_v16 = vsel %vm629_vm5, %v609_v19, %v644_v14  ;;  %v106_v2 = vmax.f32 %v42_v53, %v105_v63  ;;  %v249_v3 = vrot.slane %v66_v60, 4  ;;  %v142_v5 = vmax.f32 %v48_v54, %v141_v0  ;;  %1027 = vmatpush.bf16.msrb.mxu0 %v1288_v12  ;;  %v1660_v14 = vld [vmem:[%s1725_s0 + $0x58] sm:$0xff] }
  0x4d   :  { %v646_v4 = vsel %vm631_vm6, %v615_v13, %v645_v16  ;;  %v178_v7 = vmax.f32 %v54_v56, %v177_v1  ;;  %v285_v8 = vrot.slane %v72_v61, 4  ;;  %v214_v26 = vmax.f32 %v60_v57, %v213_v17  ;;  %1040 = vmatpush.bf16.msrb.mxu1 %v1296_v15  ;;  %v1655_v13 = vld [vmem:[%s1725_s0 + $0x40] sm:$0xff]  ;;  %v1670_v17 = vld [vmem:[%s1725_s0 + $0x88] sm:$0xff] }
  0x4e   :  { %v670_v9 = vpack.c.b16 %v646_v4, %v646_v4  ;;  %v107_v10 = vrot.slane %v106_v2, 2  ;;  %v250_v27 = vmax.f32 %v66_v60, %v249_v3  ;;  %v143_v21 = vrot.slane %v142_v5, 2 }
  0x4f   :  { %v179_v22 = vrot.slane %v178_v7, 2  ;;  %v286_v28 = vmax.f32 %v72_v61, %v285_v8  ;;  %v321_v23 = vrot.slane %v78_v20, 4  ;;  %v215_v29 = vrot.slane %v214_v26, 2  ;;  %v1677_v8 = vld [vmem:[%s1725_s0 + $0xa0] sm:$0xff] }
  0x50   :  { %1002 = vmatmul.bf16.vlgmr.msra.gmra.mxu2 %v670_v9  ;;  %v108_v24 = vmax.f32 %v106_v2, %v107_v10  ;;  %v251_v30 = vrot.slane %v250_v27, 2  ;;  %v357_v32 = vrot.slane %v84_v6, 4  ;;  %v144_v18 = vmax.f32 %v142_v5, %v143_v21  ;;  %v1665_v2 = vld [vmem:[%s1725_s0 + $0x70] sm:$0xff]  ;;  %v1682_v9 = vld [vmem:[%s1725_s0 + $0xb8] sm:$0xff] }
  0x51   :  { %v180_v31 = vmax.f32 %v178_v7, %v179_v22  ;;  %v287_v33 = vrot.slane %v286_v28, 2  ;;  %v322_v34 = vmax.f32 %v78_v20, %v321_v23  ;;  %v216_v36 = vmax.f32 %v214_v26, %v215_v29  ;;  %v1650_v20 = vld [vmem:[%s1725_s0 + $0x28] sm:$0xff] }
  0x52   :  { %v109_v35 = vrot.slane %v108_v24, 1  ;;  %v252_v37 = vmax.f32 %v250_v27, %v251_v30  ;;  %v358_v38 = vmax.f32 %v84_v6, %v357_v32  ;;  %v145_v39 = vrot.slane %v144_v18, 1 }
  0x53   :  { %v181_v40 = vrot.slane %v180_v31, 1  ;;  %v288_v41 = vmax.f32 %v286_v28, %v287_v33  ;;  %v323_v42 = vrot.slane %v322_v34, 2  ;;  %v217_v44 = vrot.slane %v216_v36, 1 }
  0x54   :  { %v110_v43 = vmax.f32 %v108_v24, %v109_v35  ;;  %v253_v45 = vrot.slane %v252_v37, 1  ;;  %v359_v46 = vrot.slane %v358_v38, 2  ;;  %v146_v47 = vmax.f32 %v144_v18, %v145_v39 }
  0x55   :  { %v182_v48 = vmax.f32 %v180_v31, %v181_v40  ;;  %v289_v49 = vrot.slane %v288_v41, 1  ;;  %v324_v50 = vmax.f32 %v322_v34, %v323_v42  ;;  %v218_v51 = vmax.f32 %v216_v36, %v217_v44 }
  0x56   :  { %v254_v52 = vmax.f32 %v252_v37, %v253_v45  ;;  %v360_v53 = vmax.f32 %v358_v38, %v359_v46  ;;  %v378_v54 = vpack.c.bf16 %v110_v43, %v110_v43  ;;  %v384_v56 = vpack.c.bf16 %v146_v47, %v146_v47 }
  0x57   :  { %v290_v19 = vmax.f32 %v288_v41, %v289_v49  ;;  %v325_v55 = vrot.slane %v324_v50, 1  ;;  %v390_v57 = vpack.c.bf16 %v182_v48, %v182_v48  ;;  %v396_v60 = vpack.c.bf16 %v218_v51, %v218_v51 }
  0x58   :  { %v361_v59 = vrot.slane %v360_v53, 1  ;;  %v402_v61 = vpack.c.bf16 %v254_v52, %v254_v52  ;;  %v574_v62 = vunpack.c.l.b16 %v378_v54  ;;  %v580_v25 = vunpack.c.l.b16 %v384_v56 }
  0x59   :  { %v326_v6 = vmax.f32 %v324_v50, %v325_v55  ;;  %v408_v63 = vpack.c.bf16 %v290_v19, %v290_v19  ;;  %v586_v11 = vunpack.c.l.b16 %v390_v57  ;;  %v592_v1 = vunpack.c.l.b16 %v396_v60 }
  0x5a   :  { %v362_v0 = vmax.f32 %v360_v53, %v361_v59  ;;  %v598_v16 = vunpack.c.l.b16 %v402_v61  ;;  %v43_v3 = vunpack.c.l.bf16 %v1645_v58  ;;  %v647_v7 = vsel %vm619_vm0, %v580_v25, %v574_v62 }
  0x5b   :  { %v414_v4 = vpack.c.bf16 %v326_v6, %v326_v6  ;;  %v604_v5 = vunpack.c.l.b16 %v408_v63  ;;  %v49_v10 = vunpack.c.l.bf16 %v1650_v20  ;;  %v648_v27 = vsel %vm621_vm1, %v586_v11, %v647_v7 }
  0x5c   :  { %v420_v26 = vpack.c.bf16 %v362_v0, %v362_v0  ;;  %v55_v12 = vunpack.c.l.bf16 %v1655_v13  ;;  %v61_v15 = vunpack.c.l.bf16 %v1660_v14  ;;  %v649_v22 = vsel %vm623_vm2, %v592_v1, %v648_v27 }
  0x5d   :  { %v610_v21 = vunpack.c.l.b16 %v414_v4  ;;  %v67_v28 = vunpack.c.l.bf16 %v1665_v2  ;;  %v73_v23 = vunpack.c.l.bf16 %v1670_v17  ;;  %v650_v29 = vsel %vm625_vm3, %v598_v16, %v649_v22 }
  0x5e   :  { %v616_v24 = vunpack.c.l.b16 %v420_v26  ;;  %v79_v30 = vunpack.c.l.bf16 %v1677_v8  ;;  %v85_v32 = vunpack.c.l.bf16 %v1682_v9  ;;  %v651_v18 = vsel %vm627_vm4, %v604_v5, %v650_v29 }
  0x5f   :  { %v111_v31 = vrot.slane %v43_v3, 4  ;;  %v147_v33 = vrot.slane %v49_v10, 4  ;;  %v183_v34 = vrot.slane %v55_v12, 4  ;;  %v652_v35 = vsel %vm629_vm5, %v610_v21, %v651_v18 }
  0x60   :  { %v219_v36 = vrot.slane %v61_v15, 4  ;;  %v255_v37 = vrot.slane %v67_v28, 4  ;;  %v291_v38 = vrot.slane %v73_v23, 4  ;;  %v653_v39 = vsel %vm631_vm6, %v616_v24, %v652_v35 }
  0x61   :  { %v112_v40 = vmax.f32 %v43_v3, %v111_v31  ;;  %v148_v41 = vmax.f32 %v49_v10, %v147_v33  ;;  %v184_v42 = vmax.f32 %v55_v12, %v183_v34  ;;  %v671_v43 = vpack.c.b16 %v653_v39, %v653_v39 }
  0x62   :  { %v220_v44 = vmax.f32 %v61_v15, %v219_v36  ;;  %v256_v45 = vmax.f32 %v67_v28, %v255_v37  ;;  %v292_v46 = vmax.f32 %v73_v23, %v291_v38  ;;  %v327_v50 = vrot.slane %v79_v30, 4 }
  0x63   :  { %v113_v47 = vrot.slane %v112_v40, 2  ;;  %v149_v48 = vrot.slane %v148_v41, 2  ;;  %v185_v49 = vrot.slane %v184_v42, 2  ;;  %1015 = vmatmul.bf16.vlgmr.msra.gmra.mxu3 %v671_v43  ;;  %v363_v54 = vrot.slane %v85_v32, 4 }
  0x64   :  { %v221_v51 = vrot.slane %v220_v44, 2  ;;  %v257_v52 = vrot.slane %v256_v45, 2  ;;  %v293_v53 = vrot.slane %v292_v46, 2  ;;  %v328_v57 = vmax.f32 %v79_v30, %v327_v50 }
  0x65   :  { %v114_v19 = vmax.f32 %v112_v40, %v113_v47  ;;  %v150_v55 = vmax.f32 %v148_v41, %v149_v48  ;;  %v186_v56 = vmax.f32 %v184_v42, %v185_v49  ;;  %v364_v62 = vmax.f32 %v85_v32, %v363_v54 }
  0x66   :  { %v222_v59 = vmax.f32 %v220_v44, %v221_v51  ;;  %v258_v60 = vmax.f32 %v256_v45, %v257_v52  ;;  %v294_v61 = vmax.f32 %v292_v46, %v293_v53  ;;  %v329_v11 = vrot.slane %v328_v57, 2 }
  0x67   :  { %v115_v6 = vrot.slane %v114_v19, 1  ;;  %v151_v63 = vrot.slane %v150_v55, 1  ;;  %v187_v25 = vrot.slane %v186_v56, 1  ;;  %v365_v3 = vrot.slane %v364_v62, 2 }
  0x68   :  { %v223_v0 = vrot.slane %v222_v59, 1  ;;  %v259_v1 = vrot.slane %v258_v60, 1  ;;  %v295_v16 = vrot.slane %v294_v61, 1  ;;  %v330_v10 = vmax.f32 %v328_v57, %v329_v11 }
  0x69   :  { %v116_v4 = vmax.f32 %v114_v19, %v115_v6  ;;  %v152_v5 = vmax.f32 %v150_v55, %v151_v63  ;;  %v188_v7 = vmax.f32 %v186_v56, %v187_v25  ;;  %v366_v15 = vmax.f32 %v364_v62, %v365_v3 }
  0x6a   :  { %v224_v26 = vmax.f32 %v222_v59, %v223_v0  ;;  %v260_v27 = vmax.f32 %v258_v60, %v259_v1  ;;  %v296_v12 = vmax.f32 %v294_v61, %v295_v16  ;;  %v331_v21 = vrot.slane %v330_v10, 1 }
  0x6b   :  { %v379_v22 = vpack.c.bf16 %v116_v4, %v116_v4  ;;  %v385_v28 = vpack.c.bf16 %v152_v5, %v152_v5  ;;  %v391_v23 = vpack.c.bf16 %v188_v7, %v188_v7  ;;  %v367_v24 = vrot.slane %v366_v15, 1 }
  0x6c   :  { %v397_v29 = vpack.c.bf16 %v224_v26, %v224_v26  ;;  %v403_v30 = vpack.c.bf16 %v260_v27, %v260_v27  ;;  %v409_v32 = vpack.c.bf16 %v296_v12, %v296_v12  ;;  %v332_v18 = vmax.f32 %v330_v10, %v331_v21 }
  0x6d   :  { %v575_v31 = vunpack.c.l.b16 %v379_v22  ;;  %v581_v33 = vunpack.c.l.b16 %v385_v28  ;;  %v587_v34 = vunpack.c.l.b16 %v391_v23  ;;  %v368_v35 = vmax.f32 %v366_v15, %v367_v24 }
  0x6e   :  { %v593_v36 = vunpack.c.l.b16 %v397_v29  ;;  %v599_v37 = vunpack.c.l.b16 %v403_v30  ;;  %v605_v38 = vunpack.c.l.b16 %v409_v32  ;;  %v415_v39 = vpack.c.bf16 %v332_v18, %v332_v18 }
  0x6f   :  { %v654_v40 = vsel %vm619_vm0, %v581_v33, %v575_v31  ;;  %v44_v41 = vunpack.c.h.bf16 %v1645_v58  ;;  %v50_v42 = vunpack.c.h.bf16 %v1650_v20  ;;  %v421_v43 = vpack.c.bf16 %v368_v35, %v368_v35 }
  0x70   :  { %v655_v44 = vsel %vm621_vm1, %v587_v34, %v654_v40  ;;  %v56_v45 = vunpack.c.h.bf16 %v1655_v13  ;;  %v62_v46 = vunpack.c.h.bf16 %v1660_v14  ;;  %v611_v47 = vunpack.c.l.b16 %v415_v39 }
  0x71   :  { %v656_v48 = vsel %vm623_vm2, %v593_v36, %v655_v44  ;;  %v68_v49 = vunpack.c.h.bf16 %v1665_v2  ;;  %v74_v50 = vunpack.c.h.bf16 %v1670_v17  ;;  %v617_v51 = vunpack.c.l.b16 %v421_v43 }
  0x72   :  { %v657_v52 = vsel %vm625_vm3, %v599_v37, %v656_v48  ;;  %v80_v58 = vunpack.c.h.bf16 %v1677_v8  ;;  %v86_v20 = vunpack.c.h.bf16 %v1682_v9  ;;  %v117_v54 = vrot.slane %v44_v41, 4 }
  0x73   :  { %v658_v53 = vsel %vm627_vm4, %v605_v38, %v657_v52  ;;  %v153_v13 = vrot.slane %v50_v42, 4  ;;  %v189_v19 = vrot.slane %v56_v45, 4  ;;  %v225_v55 = vrot.slane %v62_v46, 4 }
  0x74   :  { %v659_v14 = vsel %vm629_vm5, %v611_v47, %v658_v53  ;;  %v261_v56 = vrot.slane %v68_v49, 4  ;;  %v297_v57 = vrot.slane %v74_v50, 4  ;;  %v118_v17 = vmax.f32 %v44_v41, %v117_v54 }
  0x75   :  { %v660_v2 = vsel %vm631_vm6, %v617_v51, %v659_v14  ;;  %v154_v59 = vmax.f32 %v50_v42, %v153_v13  ;;  %v190_v60 = vmax.f32 %v56_v45, %v189_v19  ;;  %v226_v62 = vmax.f32 %v62_v46, %v225_v55 }
  0x76   :  { %v672_v61 = vpack.c.b16 %v660_v2, %v660_v2  ;;  %v262_v8 = vmax.f32 %v68_v49, %v261_v56  ;;  %v298_v6 = vmax.f32 %v74_v50, %v297_v57  ;;  %v119_v9 = vrot.slane %v118_v17, 2 }
  0x77   :  { %v155_v63 = vrot.slane %v154_v59, 2  ;;  %v191_v25 = vrot.slane %v190_v60, 2  ;;  %v333_v11 = vrot.slane %v80_v58, 4  ;;  %v227_v0 = vrot.slane %v226_v62, 2 }
  0x78   :  { %1028 = vmatmul.bf16.vlgmr.msrb.gmra.mxu0 %v672_v61  ;;  %v263_v1 = vrot.slane %v262_v8, 2  ;;  %v299_v16 = vrot.slane %v298_v6, 2  ;;  %v369_v3 = vrot.slane %v86_v20, 4  ;;  %v120_v4 = vmax.f32 %v118_v17, %v119_v9 }
  0x79   :  { %v156_v5 = vmax.f32 %v154_v59, %v155_v63  ;;  %v192_v7 = vmax.f32 %v190_v60, %v191_v25  ;;  %v334_v10 = vmax.f32 %v80_v58, %v333_v11  ;;  %v228_v26 = vmax.f32 %v226_v62, %v227_v0 }
  0x7a   :  { %v264_v27 = vmax.f32 %v262_v8, %v263_v1  ;;  %v300_v12 = vmax.f32 %v298_v6, %v299_v16  ;;  %v370_v15 = vmax.f32 %v86_v20, %v369_v3  ;;  %v121_v21 = vrot.slane %v120_v4, 1  ;;  %v1305_v8 = vld [vmem:[%s1727_s2] ss:$0 sm:$0xff] }
  0x7b   :  { %v157_v22 = vrot.slane %v156_v5, 1  ;;  %v193_v28 = vrot.slane %v192_v7, 1  ;;  %v335_v23 = vrot.slane %v334_v10, 2  ;;  %v229_v24 = vrot.slane %v228_v26, 1 }
  0x7c   :  { %v265_v29 = vrot.slane %v264_v27, 1  ;;  %v301_v30 = vrot.slane %v300_v12, 1  ;;  %v371_v32 = vrot.slane %v370_v15, 2  ;;  %v122_v18 = vmax.f32 %v120_v4, %v121_v21 }
  0x7d   :  { %v158_v31 = vmax.f32 %v156_v5, %v157_v22  ;;  %v194_v33 = vmax.f32 %v192_v7, %v193_v28  ;;  %v336_v34 = vmax.f32 %v334_v10, %v335_v23  ;;  %v230_v35 = vmax.f32 %v228_v26, %v229_v24 }
  0x7e   :  { %v266_v36 = vmax.f32 %v264_v27, %v265_v29  ;;  %v302_v37 = vmax.f32 %v300_v12, %v301_v30  ;;  %v372_v38 = vmax.f32 %v370_v15, %v371_v32  ;;  %v380_v40 = vpack.c.bf16 %v122_v18, %v122_v18 }
  0x7f   :  { %v337_v39 = vrot.slane %v336_v34, 1  ;;  %v386_v41 = vpack.c.bf16 %v158_v31, %v158_v31  ;;  %v392_v42 = vpack.c.bf16 %v194_v33, %v194_v33  ;;  %v398_v44 = vpack.c.bf16 %v230_v35, %v230_v35 }
  0x80   :  { %v373_v43 = vrot.slane %v372_v38, 1  ;;  %v404_v45 = vpack.c.bf16 %v266_v36, %v266_v36  ;;  %v410_v46 = vpack.c.bf16 %v302_v37, %v302_v37  ;;  %v576_v48 = vunpack.c.l.b16 %v380_v40 }
  0x81   :  { %v338_v47 = vmax.f32 %v336_v34, %v337_v39  ;;  %v582_v49 = vunpack.c.l.b16 %v386_v41  ;;  %v588_v50 = vunpack.c.l.b16 %v392_v42  ;;  %v594_v52 = vunpack.c.l.b16 %v398_v44 }
  0x82   :  { %v374_v51 = vmax.f32 %v372_v38, %v373_v43  ;;  %v600_v58 = vunpack.c.l.b16 %v404_v45  ;;  %v606_v53 = vunpack.c.l.b16 %v410_v46  ;;  %vm1046_vm7 = vcmask 523264  }
  0x83   :  { %v416_v20 = vpack.c.bf16 %v338_v47, %v338_v47  ;;  %v661_v54 = vsel %vm619_vm0, %v582_v49, %v576_v48 }
  0x84   :  { %v422_v13 = vpack.c.bf16 %v374_v51, %v374_v51  ;;  %v662_v19 = vsel %vm621_vm1, %v588_v50, %v661_v54 }
  0x85   :  { %v612_v14 = vunpack.c.l.b16 %v416_v20  ;;  %v663_v55 = vsel %vm623_vm2, %v594_v52, %v662_v19 }
  0x86   :  { %v618_v56 = vunpack.c.l.b16 %v422_v13  ;;  %v664_v57 = vsel %vm625_vm3, %v600_v58, %v663_v55 }
  0x87   :  { %v665_v2 = vsel %vm627_vm4, %v606_v53, %v664_v57 }
  0x88   :  { %v666_v17 = vsel %vm629_vm5, %v612_v14, %v665_v2 }
  0x89   :  { %v667_v59 = vsel %vm631_vm6, %v618_v56, %v666_v17 }
  0x8a   :  { %v673_v60 = vpack.c.b16 %v667_v59, %v667_v59 }
  0x8c   :  { %1041 = vmatmul.bf16.vlgmr.msrb.gmra.mxu1 %v673_v60 }
  0xa8   :  { %v977_v61 = vpop.f32.mrf.mxu0 }
  0xa9   :  { %v978_v6 = vadd.f32 %v1305_v8, %v977_v61 }
  0xb0   :  { %v979_v62 = vpop.f32.mrf.mxu0 }
  0xba   :  { %v990_v9 = vpop.f32.mrf.mxu1 }
  0xbb   :  { %v991_v63 = vadd.f32 %v990_v9, %v978_v6 }
  0xc2   :  { %v992_v25 = vpop.f32.mrf.mxu1 }
  0xd3   :  { %v1003_v11 = vpop.f32.mrf.mxu2 }
  0xd4   :  { %v1004_v5 = vadd.f32 %v1003_v11, %v991_v63 }
  0xdb   :  { %v1005_v0 = vpop.f32.mrf.mxu2 }
  0xe6   :  { %v1016_v1 = vpop.f32.mrf.mxu3 }
  0xe7   :  { %v1017_v7 = vadd.f32 %v1016_v1, %v1004_v5 }
  0xee   :  { %v1018_v16 = vpop.f32.mrf.mxu3 }
  0xf5   :  { %v1029_v3 = vpop.f32.mrf.mxu0 }
  0xf6   :  { %v1030_v10 = vadd.f32 %v1029_v3, %v1017_v7 }
  0xfd   :  { %v1031_v4 = vpop.f32.mrf.mxu0 }
 0x109   :  { %v1042_v26 = vpop.f32.mrf.mxu1 }
 0x10a   :  { %v1043_v27 = vadd.f32 %v1042_v26, %v1030_v10 }
 0x10c   :  { %1047 = vst.msk [vmem:[#allocation2] sm:$0xff] %vm1046_vm7, %v1043_v27 }
 0x10d   :  { %1058 = dma.vmem_to_hbm [thread:$0]  %s1054_s22, 128, %s1056_s25, [#allocation3]  }
 0x111   :  { %v1044_v12 = vpop.f32.mrf.mxu1 }
 0x112   :  { %1330 = dma.done.wait [#allocation3], 128  }
 0x113   :  { %1331 = vsyncadd [#allocation3], 4294967168 }
 0x114   :  { %1063 = vsyncpa [#allocation3], 1 }

</bundles_post_ra>
